<compile_context>
chip_gen: v6e
topology: v6e:2x2x1
jax: 0.10.0
libtpu: 0.0.40
codegen_flags: <defaults>
</compile_context>

<pallas_src>
import functools
import math

import jax
import jax.numpy as jnp
from jax import lax
from jax.experimental import pallas as pl
from jax.experimental.pallas import tpu as pltpu

KERNEL_SIZE = 3
STRIDE = 2


def _vmem_budget_and_limit():
    """(tile budget bytes, scoped vmem limit bytes), gated per TPU generation."""
    cap = None
    try:
        cap = getattr(pltpu.get_tpu_info(), "vmem_capacity_bytes", None)
    except Exception:
        cap = None
    if cap is None:
        cap = 64 * 1024 * 1024                      # conservative default (v7x)
    if cap >= 96 * 1024 * 1024:                     # v5e / v6e: 128 MiB physical
        return 24 * 1024 * 1024, 56 * 1024 * 1024
    return 14 * 1024 * 1024, 40 * 1024 * 1024       # v7x: 64 MiB per TensorCore


def _tile_bytes(th, cb, w, wo, wv, stride, itemsize):
    """VMEM estimate for one grid step: double-buffered I/O + scratch + temps."""
    rpt = th * stride
    io_bufs = 2 * (rpt * w * cb + w * cb + th * wo * cb)   # in, halo, out (x2 bufs)
    scratch = th * wv * cb                                 # H-reduced padded rows
    temps = 4 * th * w * cb                                # live value temporaries
    return itemsize * (io_bufs + scratch + temps)


def _pick_tile_rows(ho, w, wo, wv, cb, stride, itemsize, budget):
    """Largest output-row tile whose buffers fit the per-generation budget."""
    best = 1
    for cand in range(1, min(ho, 512) + 1):
        if _tile_bytes(cand, cb, w, wo, wv, stride, itemsize) > budget:
            break
        best = cand
    # Prefer a tile count that divides the output rows (avoids a ragged tile).
    for cand in range(best, max(1, best // 2) - 1, -1):
        if ho % cand == 0:
            return cand
    return best


def _maxpool_kernel(xm_ref, xh_ref, o_ref, s_ref, *, ksize, stride, th, rpt,
                    h, w, wo, wv, pad_top, pad_left):
    """Pool one (batch, channel-block, H-tile) output block.

    xm_ref : (1, rpt, W, CB)   main input rows [hi*rpt, hi*rpt + rpt)
    xh_ref : (1, 1,   W, CB)   single halo row (above the tile if pad_top>0,
                               below it otherwise)
    o_ref  : (1, th,  Wo, CB)  pooled output tile
    s_ref  : (1, th,  Wv, CB)  scratch: H-reduced rows in padded W coordinates
    """
    hi = pl.program_id(2)
    dtype = s_ref.dtype
    cb = s_ref.shape[-1]
    zero = jnp.array(0, dtype)

    # ---- pass 1: reduce the kh taps along H (cheap outer-dim strided reads) --
    # Local output row r (global rg = hi*th + r) needs input rows
    # hi*rpt + s*r - pad_top + {0..k-1}.  Taps 0..s-1 (relative to the main
    # block) come straight from xm; the single extra tap (k == s+1) is the
    # previous/next tap shifted by one output row, with the halo row filling
    # the boundary slot.  Any tap whose input row index is >= h is the zero
    # bottom padding (or never consumed) -> masked to 0, which also sanitizes
    # the partial last block's out-of-bounds rows.
    row = lax.broadcasted_iota(jnp.int32, (1, th, 1, 1), 1)
    base = hi * rpt + stride * row
    taps = []
    for j in range(stride):
        tj = xm_ref[:, pl.ds(j, th, stride), :, :]
        taps.append(jnp.where(base + j < h, tj, zero))

    hv = xh_ref[...]
    if pad_top > 0:
        halo_is_pad = hi == 0                   # halo == the top zero-pad row
    else:
        halo_is_pad = (hi + 1) * rpt >= h       # halo is past the last row
    hv = jnp.where(halo_is_pad, jnp.zeros_like(hv), hv)

    if th == 1:
        extra = hv
    elif pad_top > 0:
        # extra tap sits ABOVE the window start: previous row of tap s-1.
        extra = jnp.concatenate([hv, taps[stride - 1][:, :th - 1]], axis=1)
    else:
        # extra tap sits BELOW the window start: next row of tap 0.
        extra = jnp.concatenate([taps[0][:, 1:], hv], axis=1)

    hred = extra
    for tj in taps:
        hred = jnp.maximum(hred, tj)

    # ---- fold the zero W padding in + pass 2: reduce the kw taps along W ----
    # One full-width store of the H-reduced rows at their padded W offset,
    # plus tiny zero stores for the pad columns (F.pad pads with zeros, so the
    # max naturally picks them up at the boundaries).
    s_ref[:, :, pad_left:pad_left + w, :] = hred
    if pad_left > 0:
        s_ref[:, :, :pad_left, :] = jnp.zeros((1, th, pad_left, cb), dtype)
    if wv > pad_left + w:
        s_ref[:, :, pad_left + w:, :] = jnp.zeros(
            (1, th, wv - pad_left - w, cb), dtype)

    acc = s_ref[:, :, pl.ds(0, wo, stride), :]
    for kw in range(1, ksize):
        acc = jnp.maximum(acc, s_ref[:, :, pl.ds(kw, wo, stride), :])
    o_ref[...] = acc.astype(o_ref.dtype)


def maxpool2d_same_nhwc(x, kernel_size=KERNEL_SIZE, stride=STRIDE,
                        tile_rows=None):
    """Core Pallas kernel; NHWC layout (channels on the TPU lane axis)."""
    n, h, w, c = x.shape
    k, s = kernel_size, stride

    pad_h = max((math.ceil(h / s) - 1) * s + k - h, 0)
    pad_w = max((math.ceil(w / s) - 1) * s + k - w, 0)
    pad_top, pad_left = pad_h // 2, pad_w // 2
    ho = (h + pad_h - k) // s + 1
    wo = (w + pad_w - k) // s + 1
    wv = w + pad_w                         # padded ("virtual") width in scratch

    # The tiled fast path carries a single halo row between H tiles; this
    # covers the (3, 2) configuration EfficientDet always uses.
    if (k - s) != 1 or pad_top > 1:
        # TODO(synk): general (kernel_size, stride) combos need a multi-row halo.
        raise NotImplementedError(
            "maxpool2d_same_nhwc supports kernel_size == stride + 1 with a "
            f"<=1-row top pad (got kernel_size={k}, stride={s}).")

    budget, vmem_limit = _vmem_budget_and_limit()
    itemsize = jnp.dtype(x.dtype).itemsize

    # Lane-dense channel blocking: multiples of 128 when C allows (widened to
    # fill the budget on deep low-resolution levels), else the full C.
    if c % 128 == 0:
        cb = 128
        while (c % (cb * 2) == 0 and cb * 2 <= 1024 and
               _tile_bytes(min(ho, 8), cb * 2, w, wo, wv, s, itemsize) <= budget):
            cb *= 2
    else:
        # TODO(synk): C not a multiple of 128 keeps a <128-lane output store.
        cb = c
    n_cb = c // cb

    if tile_rows is None:
        th = _pick_tile_rows(ho, w, wo, wv, cb, s, itemsize, budget)
    else:
        th = max(1, min(int(tile_rows), ho))
    rpt = th * s                        # input rows per tile (minus the halo)
    n_ht = -(-ho // th)

    kernel = functools.partial(
        _maxpool_kernel, ksize=k, stride=s, th=th, rpt=rpt, h=h, w=w, wo=wo,
        wv=wv, pad_top=pad_top, pad_left=pad_left)

    if pad_top > 0:   # halo = row just above the tile (top pad row for hi==0)
        halo_map = lambda ni, ci, hi: (ni, jnp.maximum(hi * rpt - pad_top, 0), 0, ci)
    else:             # halo = row just below the tile (clamped; masked if pad)
        halo_map = lambda ni, ci, hi: (ni, jnp.minimum((hi + 1) * rpt, h - 1), 0, ci)

    cost = pl.CostEstimate(
        flops=n * ho * wo * c * (k * k - 1),
        transcendentals=0,
        bytes_accessed=(n * h * w * c + n * n_ht * w * c + n * ho * wo * c)
        * itemsize)

    return pl.pallas_call(
        kernel,
        out_shape=jax.ShapeDtypeStruct((n, ho, wo, c), x.dtype),
        grid=(n, n_cb, n_ht),
        in_specs=[
            pl.BlockSpec((1, rpt, w, cb), lambda ni, ci, hi: (ni, hi, 0, ci)),
            pl.BlockSpec((1, 1, w, cb), halo_map),
        ],
        out_specs=pl.BlockSpec((1, th, wo, cb), lambda ni, ci, hi: (ni, hi, 0, ci)),
        scratch_shapes=[pltpu.VMEM((1, th, wv, cb), x.dtype)],
        compiler_params=pltpu.CompilerParams(
            dimension_semantics=("parallel", "parallel", "parallel"),
            vmem_limit_bytes=vmem_limit),
        cost_estimate=cost,
    )(x, x)


def maxpool2d_static_same_padding(x_nchw, kernel_size=KERNEL_SIZE,
                                  stride=STRIDE, tile_rows=None):
    """Drop-in for MaxPool2dStaticSamePadding.forward (NCHW in / NCHW out)."""
    # NCHW <-> NHWC are interface glue only; a model that keeps NHWC
    # activations should call maxpool2d_same_nhwc directly and skip both.
    x = jnp.transpose(x_nchw, (0, 2, 3, 1))
    y = maxpool2d_same_nhwc(x, kernel_size, stride, tile_rows)
    return jnp.transpose(y, (0, 3, 1, 2))


def _reference(x_nchw, kernel_size=KERNEL_SIZE, stride=STRIDE):
    """Pure-JAX reference with identical semantics (correctness check)."""
    n, c, h, w = x_nchw.shape
    pad_h = max((math.ceil(h / stride) - 1) * stride + kernel_size - h, 0)
    pad_w = max((math.ceil(w / stride) - 1) * stride + kernel_size - w, 0)
    xp = jnp.pad(
        x_nchw,
        ((0, 0), (0, 0),
         (pad_h // 2, pad_h - pad_h // 2),
         (pad_w // 2, pad_w - pad_w // 2)),
        constant_values=0.0)
    return lax.reduce_window(
        xp, -jnp.inf, lax.max,
        window_dimensions=(1, 1, kernel_size, kernel_size),
        window_strides=(1, 1, stride, stride),
        padding="VALID")


if __name__ == "__main__":
    # The module has no learnable parameters (pure pooling).
    key = jax.random.PRNGKey(0)
    x = jax.random.normal(key, (2, 4, 16, 16), dtype=jnp.float32)  # NCHW

    pool = jax.jit(maxpool2d_static_same_padding)
    out = jax.block_until_ready(pool(x))
    ref = _reference(x)
    assert out.shape == ref.shape, (out.shape, ref.shape)
    assert jnp.allclose(out, ref, atol=1e-6, rtol=1e-6), "mismatch vs reference"

    # Exercise the tiled path (multiple H tiles, halo row, ragged last tile),
    # odd spatial sizes / asymmetric padding, and the 128-lane channel block.
    for shape, tr in (((2, 4, 16, 16), 3), ((1, 4, 15, 13), 2),
                      ((1, 128, 12, 9), None)):
        xs = jax.random.normal(jax.random.PRNGKey(1), shape, dtype=jnp.float32)
        got = jax.block_until_ready(
            maxpool2d_static_same_padding(xs, tile_rows=tr))
        exp = _reference(xs)
        assert got.shape == exp.shape, (got.shape, exp.shape)
        assert jnp.allclose(got, exp, atol=1e-6, rtol=1e-6), f"mismatch {shape}"

    print("KERNEL_OK")
</pallas_src>

<mosaic_0001>
module attributes {stable_mosaic.version = 11 : i64} {
  func.func @_maxpool_kernel(%arg0: i32, %arg1: i32, %arg2: i32, %arg3: memref<1x16x16x4xf32, #tpu.memory_space<vmem>>, %arg4: memref<1x1x16x4xf32, #tpu.memory_space<vmem>>, %arg5: memref<1x8x8x4xf32, #tpu.memory_space<vmem>>, %arg6: memref<1x8x17x4xf32, #tpu.memory_space<vmem>>) attributes {dimension_semantics = [#tpu.dimension_semantics<parallel>, #tpu.dimension_semantics<parallel>, #tpu.dimension_semantics<parallel>], iteration_bounds = array<i64: 2, 1, 1>, scalar_prefetch = 0 : i64, scratch_operands = 1 : i64, tpu.core_type = #tpu.core_type<tc>, window_params = [{transform_indices = @transform_0, window_bounds = array<i64: 1, 16, 16, 4>}, {transform_indices = @transform_1, window_bounds = array<i64: 1, 1, 16, 4>}, {transform_indices = @transform_2, window_bounds = array<i64: 1, 8, 8, 4>}]} {
    %0 = tpu.iota {dimensions = array<i32: 1>} : vector<1x8x1x1xi32>
    %c16_i32 = arith.constant 16 : i32
    %1 = arith.muli %arg2, %c16_i32 : i32
    %c2_i32 = arith.constant 2 : i32
    %2 = vector.broadcast %c2_i32 : i32 to vector<1x8x1x1xi32>
    %3 = arith.muli %2, %0 : vector<1x8x1x1xi32>
    %4 = vector.broadcast %1 : i32 to vector<1x8x1x1xi32>
    %5 = arith.addi %4, %3 : vector<1x8x1x1xi32>
    %c0 = arith.constant 0 : index
    %c0_0 = arith.constant 0 : index
    %c0_1 = arith.constant 0 : index
    %c0_2 = arith.constant 0 : index
    %6 = tpu.strided_load %arg3[%c0, %c0_0, %c0_1, %c0_2] {strides = array<i32: 1, 2, 1, 1>} : memref<1x16x16x4xf32, #tpu.memory_space<vmem>>, vector<1x8x16x4xf32>
    %c0_i32 = arith.constant 0 : i32
    %7 = vector.broadcast %c0_i32 : i32 to vector<1x8x1x1xi32>
    %8 = arith.addi %5, %7 : vector<1x8x1x1xi32>
    %c16_i32_3 = arith.constant 16 : i32
    %9 = vector.broadcast %c16_i32_3 : i32 to vector<1x8x1x1xi32>
    %10 = arith.cmpi slt, %8, %9 : vector<1x8x1x1xi32>
    %cst = arith.constant 0.000000e+00 : f32
    %11 = vector.shape_cast %10 : vector<1x8x1x1xi1> to vector<1x8x1x1xi1>
    %12 = vector.broadcast %11 : vector<1x8x1x1xi1> to vector<1x8x16x4xi1>
    %13 = vector.broadcast %cst : f32 to vector<1x8x16x4xf32>
    %14 = arith.select %12, %6, %13 : vector<1x8x16x4xi1>, vector<1x8x16x4xf32>
    %c0_4 = arith.constant 0 : index
    %c1 = arith.constant 1 : index
    %c0_5 = arith.constant 0 : index
    %c0_6 = arith.constant 0 : index
    %15 = tpu.strided_load %arg3[%c0_4, %c1, %c0_5, %c0_6] {strides = array<i32: 1, 2, 1, 1>} : memref<1x16x16x4xf32, #tpu.memory_space<vmem>>, vector<1x8x16x4xf32>
    %c1_i32 = arith.constant 1 : i32
    %16 = vector.broadcast %c1_i32 : i32 to vector<1x8x1x1xi32>
    %17 = arith.addi %5, %16 : vector<1x8x1x1xi32>
    %c16_i32_7 = arith.constant 16 : i32
    %18 = vector.broadcast %c16_i32_7 : i32 to vector<1x8x1x1xi32>
    %19 = arith.cmpi slt, %17, %18 : vector<1x8x1x1xi32>
    %cst_8 = arith.constant 0.000000e+00 : f32
    %20 = vector.shape_cast %19 : vector<1x8x1x1xi1> to vector<1x8x1x1xi1>
    %21 = vector.broadcast %20 : vector<1x8x1x1xi1> to vector<1x8x16x4xi1>
    %22 = vector.broadcast %cst_8 : f32 to vector<1x8x16x4xf32>
    %23 = arith.select %21, %15, %22 : vector<1x8x16x4xi1>, vector<1x8x16x4xf32>
    %c0_9 = arith.constant 0 : index
    %c0_10 = arith.constant 0 : index
    %c0_11 = arith.constant 0 : index
    %c0_12 = arith.constant 0 : index
    %24 = vector.load %arg4[%c0_9, %c0_10, %c0_11, %c0_12] : memref<1x1x16x4xf32, #tpu.memory_space<vmem>>, vector<1x1x16x4xf32>
    %c1_i32_13 = arith.constant 1 : i32
    %25 = arith.addi %arg2, %c1_i32_13 : i32
    %c16_i32_14 = arith.constant 16 : i32
    %26 = arith.muli %25, %c16_i32_14 : i32
    %c16_i32_15 = arith.constant 16 : i32
    %27 = arith.cmpi sge, %26, %c16_i32_15 : i32
    %cst_16 = arith.constant 0.000000e+00 : f32
    %28 = vector.broadcast %cst_16 : f32 to vector<1x1x16x4xf32>
    %29 = arith.select %27, %28, %24 : vector<1x1x16x4xf32>
    %30 = vector.extract_strided_slice %14 {offsets = [0, 1, 0, 0], sizes = [1, 7, 16, 4], strides = [1, 1, 1, 1]} : vector<1x8x16x4xf32> to vector<1x7x16x4xf32>
    %31 = tpu.concatenate %30, %29 in 1 : vector<1x7x16x4xf32>, vector<1x1x16x4xf32> -> vector<1x8x16x4xf32>
    %32 = arith.maximumf %31, %14 : vector<1x8x16x4xf32>
    %33 = arith.maximumf %32, %23 : vector<1x8x16x4xf32>
    %c0_17 = arith.constant 0 : index
    %c0_18 = arith.constant 0 : index
    %c0_19 = arith.constant 0 : index
    %c0_20 = arith.constant 0 : index
    %34 = vector.load %arg6[%c0_17, %c0_18, %c0_19, %c0_20] : memref<1x8x17x4xf32, #tpu.memory_space<vmem>>, vector<1x8x16x4xf32>
    tpu.vector_store %arg6[%c0_17, %c0_18, %c0_19, %c0_20], %33 {strides = array<i32>} : memref<1x8x17x4xf32, #tpu.memory_space<vmem>>, vector<1x8x16x4xf32>,
    %cst_21 = arith.constant 0.000000e+00 : f32
    %35 = vector.broadcast %cst_21 : f32 to vector<1x8x1x4xf32>
    %c0_22 = arith.constant 0 : index
    %c0_23 = arith.constant 0 : index
    %c16 = arith.constant 16 : index
    %c0_24 = arith.constant 0 : index
    %36 = vector.load %arg6[%c0_22, %c0_23, %c16, %c0_24] : memref<1x8x17x4xf32, #tpu.memory_space<vmem>>, vector<1x8x1x4xf32>
    tpu.vector_store %arg6[%c0_22, %c0_23, %c16, %c0_24], %35 {strides = array<i32>} : memref<1x8x17x4xf32, #tpu.memory_space<vmem>>, vector<1x8x1x4xf32>,
    %c0_25 = arith.constant 0 : index
    %c0_26 = arith.constant 0 : index
    %c0_27 = arith.constant 0 : index
    %c0_28 = arith.constant 0 : index
    %37 = tpu.strided_load %arg6[%c0_25, %c0_26, %c0_27, %c0_28] {strides = array<i32: 1, 1, 2, 1>} : memref<1x8x17x4xf32, #tpu.memory_space<vmem>>, vector<1x8x8x4xf32>
    %c0_29 = arith.constant 0 : index
    %c0_30 = arith.constant 0 : index
    %c1_31 = arith.constant 1 : index
    %c0_32 = arith.constant 0 : index
    %38 = tpu.strided_load %arg6[%c0_29, %c0_30, %c1_31, %c0_32] {strides = array<i32: 1, 1, 2, 1>} : memref<1x8x17x4xf32, #tpu.memory_space<vmem>>, vector<1x8x8x4xf32>
    %39 = arith.maximumf %37, %38 : vector<1x8x8x4xf32>
    %c0_33 = arith.constant 0 : index
    %c0_34 = arith.constant 0 : index
    %c2 = arith.constant 2 : index
    %c0_35 = arith.constant 0 : index
    %40 = tpu.strided_load %arg6[%c0_33, %c0_34, %c2, %c0_35] {strides = array<i32: 1, 1, 2, 1>} : memref<1x8x17x4xf32, #tpu.memory_space<vmem>>, vector<1x8x8x4xf32>
    %41 = arith.maximumf %39, %40 : vector<1x8x8x4xf32>
    %c0_36 = arith.constant 0 : index
    %c0_37 = arith.constant 0 : index
    %c0_38 = arith.constant 0 : index
    %c0_39 = arith.constant 0 : index
    %42 = vector.load %arg5[%c0_36, %c0_37, %c0_38, %c0_39] : memref<1x8x8x4xf32, #tpu.memory_space<vmem>>, vector<1x8x8x4xf32>
    tpu.vector_store %arg5[%c0_36, %c0_37, %c0_38, %c0_39], %41 {strides = array<i32>} : memref<1x8x8x4xf32, #tpu.memory_space<vmem>>, vector<1x8x8x4xf32>,
    return
  }
  func.func @transform_0(%arg0: i32, %arg1: i32, %arg2: i32) -> (i32, i32, i32, i32) {
    %c0_i32 = arith.constant 0 : i32
    %c0_i32_0 = arith.constant 0 : i32
    return %arg0, %arg2, %c0_i32, %arg1 : i32, i32, i32, i32
  }
  func.func @transform_1(%arg0: i32, %arg1: i32, %arg2: i32) -> (i32, i32, i32, i32) {
    %c1_i32 = arith.constant 1 : i32
    %0 = arith.addi %arg2, %c1_i32 : i32
    %c16_i32 = arith.constant 16 : i32
    %1 = arith.muli %0, %c16_i32 : i32
    %c15_i32 = arith.constant 15 : i32
    %2 = arith.minsi %1, %c15_i32 : i32
    %c0_i32 = arith.constant 0 : i32
    %c0_i32_0 = arith.constant 0 : i32
    return %arg0, %2, %c0_i32, %arg1 : i32, i32, i32, i32
  }
  func.func @transform_2(%arg0: i32, %arg1: i32, %arg2: i32) -> (i32, i32, i32, i32) {
    %c0_i32 = arith.constant 0 : i32
    %c0_i32_0 = arith.constant 0 : i32
    return %arg0, %arg2, %c0_i32, %arg1 : i32, i32, i32, i32
  }
}

</mosaic_0001>

<bundles_post_ra>
// kernel: maxpool2d_static_same_padding.1
= control target key start
LH: loop header
LB: loop body
LE: loop exit
PB: predicated region body
PF: predicated region fallthrough
CT: control target
= control target key end

     0   :  { %s782_s9 = smov 0   ;;  %s784_s10 = smov 0   ;;  %s887_s0 = inlined_call_operand.vmem [shape: f32[2,16,16,4], index: 0, kind: input, shape index: {}, may-alias: {0,1}]   ;;  %s888_s1 = inlined_call_operand.vmem [shape: f32[2,16,16,4], index: 1, kind: input, shape index: {}, may-alias: {0,1}]   ;;  %s889_s2 = inlined_call_operand.vmem [shape: f32[2,8,8,4], index: 2, kind: output, shape index: {}]  }
   0x1   :  { %s786_s11 = smov 0  }
   0x2 LB: > { %s31_s1 = sadd.s32 1, %s760_s10  ;;  %p688_p0 = scmp.ge.s32.totalorder %s764_s11, 1  ;;  %s764_s11 = sphi %s786_s11, %s12_s11   ;;  %s760_s10 = sphi %s784_s10, %s891_s10   ;;  %s756_s9 = sphi %s782_s9, %s890_s9  }
   0x3   : > { %p33_p1 = scmp.ge.s32.totalorder %s31_s1, 2  ;;  %p185_p2 = scmp.lt.s32.totalorder %s764_s11, 3 }
   0x5   : > { %s893_s1 = smov (%p33_p1, %s31_s1), 0  ;;  %p186_p3 = pnand %p688_p0, %p185_p2 }
   0x6   : > { %p239_p4 = scmp.lt.s32.totalorder (!%p186_p3), %s756_s9, 1 }
   0x7   : > { %189 = sbr.rel (%p186_p3) target bundleno = 45 (0x2d), region = 28 }
   0xc   : > { %vm474_vm0 = vcmask 24576   ;;  %v766_v0 = vmov 0.0   ;;  %s895_s9 = smov (!%p239_p4, %s756_s9), 1  ;;  %vm457_vm1 = vcmask 31744  }
   0xd   : > { %475 = vst.msk [vmem:[#allocation2 + $0x10] sm:$0x1] %vm474_vm0, %v766_v0  ;;  %476 = vst.msk [vmem:[#allocation2 + $0x28] sm:$0x1] %vm474_vm0, %v766_v0  ;;  %s713_s12 = sshll.u32 %s895_s9, 8  ;;  %s716_s16 = sshll.u32 %s895_s9, 6 }
   0xe   : > { %477 = vst.msk [vmem:[#allocation2 + $0x40] sm:$0x1] %vm474_vm0, %v766_v0  ;;  %478 = vst.msk [vmem:[#allocation2 + $0x58] sm:$0x1] %vm474_vm0, %v766_v0  ;;  %s806_s15 = scalar_lea.vmem %s887_s0, %s713_s12  ;;  %s860_s19 = scalar_lea.vmem %s889_s2, %s716_s16 }
   0xf   : > { %479 = vst.msk [vmem:[#allocation2 + $0x70] sm:$0x1] %vm474_vm0, %v766_v0  ;;  %480 = vst.msk [vmem:[#allocation2 + $0x88] sm:$0x1] %vm474_vm0, %v766_v0  ;;  %v294_v1 = vld [vmem:[%s806_s15] sm:$0xff]  ;;  %v695_v3 = vld [vmem:[%s806_s15 + $0x10] sm:$0xff] }
  0x10   : > { %481 = vst.msk [vmem:[#allocation2 + $0xa0] sm:$0x1] %vm474_vm0, %v766_v0  ;;  %482 = vst.msk [vmem:[#allocation2 + $0xb8] sm:$0x1] %vm474_vm0, %v766_v0  ;;  %v296_v2 = vld [vmem:[%s806_s15 + $0x20] sm:$0xff]  ;;  %v295_v5 = vld [vmem:[%s806_s15 + $0x8] sm:$0xff] }
  0x11   : > { %v425_v4 = vmax.f32 %v296_v2, %v294_v1  ;;  %v297_v6 = vld [vmem:[%s806_s15 + $0x28] sm:$0xff]  ;;  %v696_v7 = vld [vmem:[%s806_s15 + $0x18] sm:$0xff]  ;;  %v298_v9 = vld [vmem:[%s806_s15 + $0x40] sm:$0xff] }
  0x12   : > { %v426_v8 = vmax.f32 %v297_v6, %v295_v5  ;;  %v697_v10 = vld [vmem:[%s806_s15 + $0x30] sm:$0xff]  ;;  %v299_v11 = vld [vmem:[%s806_s15 + $0x48] sm:$0xff]  ;;  %v427_v13 = vmax.f32 %v298_v9, %v296_v2  ;;  %v698_v14 = vld [vmem:[%s806_s15 + $0x38] sm:$0xff] }
  0x13   : > { %v441_v12 = vmax.f32 %v425_v4, %v695_v3  ;;  %v428_v15 = vmax.f32 %v299_v11, %v297_v6  ;;  %v300_v16 = vld [vmem:[%s806_s15 + $0x60] sm:$0xff]  ;;  %v699_v17 = vld [vmem:[%s806_s15 + $0x50] sm:$0xff]  ;;  %v301_v20 = vld [vmem:[%s806_s15 + $0x68] sm:$0xff] }
  0x14   : > { %v442_v18 = vmax.f32 %v426_v8, %v696_v7  ;;  %v429_v19 = vmax.f32 %v300_v16, %v298_v9  ;;  %v700_v21 = vld [vmem:[%s806_s15 + $0x58] sm:$0xff]  ;;  %v302_v22 = vld [vmem:[%s806_s15 + $0x80] sm:$0xff]  ;;  %v443_v23 = vmax.f32 %v427_v13, %v697_v10  ;;  %v430_v25 = vmax.f32 %v301_v20, %v299_v11  ;;  %v701_v26 = vld [vmem:[%s806_s15 + $0x70] sm:$0xff] }
  0x15   : > { %458 = vst.msk [vmem:[#allocation2] sm:$0xff] %vm457_vm1, %v441_v12  ;;  %v444_v24 = vmax.f32 %v428_v15, %v698_v14  ;;  %v431_v27 = vmax.f32 %v302_v22, %v300_v16  ;;  %v303_v28 = vld [vmem:[%s806_s15 + $0x88] sm:$0xff]  ;;  %v702_v29 = vld [vmem:[%s806_s15 + $0x78] sm:$0xff]  ;;  %v304_v32 = vld [vmem:[%s806_s15 + $0xa0] sm:$0xff] }
  0x16   : > { %459 = vst.msk [vmem:[#allocation2 + $0x8] sm:$0xff] %vm457_vm1, %v442_v18  ;;  %v445_v30 = vmax.f32 %v429_v19, %v699_v17  ;;  %v432_v31 = vmax.f32 %v303_v28, %v301_v20  ;;  %v703_v33 = vld [vmem:[%s806_s15 + $0x90] sm:$0xff]  ;;  %v305_v34 = vld [vmem:[%s806_s15 + $0xa8] sm:$0xff]  ;;  %460 = vst.msk [vmem:[#allocation2 + $0x18] sm:$0xff] %vm457_vm1, %v443_v23  ;;  %v446_v35 = vmax.f32 %v430_v25, %v700_v21 }
  0x17   : > { %461 = vst.msk [vmem:[#allocation2 + $0x20] sm:$0xff] %vm457_vm1, %v444_v24  ;;  %v447_v36 = vmax.f32 %v431_v27, %v701_v26  ;;  %v433_v37 = vmax.f32 %v304_v32, %v302_v22  ;;  %v704_v38 = vld [vmem:[%s806_s15 + $0x98] sm:$0xff]  ;;  %v434_v39 = vmax.f32 %v305_v34, %v303_v28  ;;  %v306_v40 = vld [vmem:[%s806_s15 + $0xc0] sm:$0xff]  ;;  %v705_v41 = vld [vmem:[%s806_s15 + $0xb0] sm:$0xff] }
  0x18   : > { %462 = vst.msk [vmem:[#allocation2 + $0x30] sm:$0xff] %vm457_vm1, %v445_v30  ;;  %v448_v42 = vmax.f32 %v432_v31, %v702_v29  ;;  %v435_v43 = vmax.f32 %v306_v40, %v304_v32  ;;  %v307_v44 = vld [vmem:[%s806_s15 + $0xc8] sm:$0xff]  ;;  %v706_v45 = vld [vmem:[%s806_s15 + $0xb8] sm:$0xff]  ;;  %v308_v46 = vld [vmem:[%s806_s15 + $0xe0] sm:$0xff] }
  0x19   : > { %463 = vst.msk [vmem:[#allocation2 + $0x38] sm:$0xff] %vm457_vm1, %v446_v35  ;;  %464 = vst.msk [vmem:[#allocation2 + $0x48] sm:$0xff] %vm457_vm1, %v447_v36  ;;  %v449_v47 = vmax.f32 %v433_v37, %v703_v33  ;;  %v450_v48 = vmax.f32 %v434_v39, %v704_v38  ;;  %v436_v49 = vmax.f32 %v307_v44, %v305_v34  ;;  %v707_v50 = vld [vmem:[%s806_s15 + $0xd0] sm:$0xff]  ;;  %v309_v52 = vld [vmem:[%s806_s15 + $0xe8] sm:$0xff]  ;;  %v439_v57 = vmax.f32 %v308_v46, 0.0 }
  0x1a   : > { %v437_v51 = vmax.f32 %v308_v46, %v306_v40  ;;  %v708_v53 = vld [vmem:[%s806_s15 + $0xd8] sm:$0xff]  ;;  %465 = vst.msk [vmem:[#allocation2 + $0x50] sm:$0xff] %vm457_vm1, %v448_v42  ;;  %v451_v54 = vmax.f32 %v435_v43, %v705_v41  ;;  %v438_v55 = vmax.f32 %v309_v52, %v307_v44  ;;  %v709_v56 = vld [vmem:[%s806_s15 + $0xf0] sm:$0xff]  ;;  %v440_v59 = vmax.f32 %v309_v52, 0.0 }
  0x1b   : > { %v710_v58 = vld [vmem:[%s806_s15 + $0xf8] sm:$0xff]  ;;  %466 = vst.msk [vmem:[#allocation2 + $0x60] sm:$0xff] %vm457_vm1, %v449_v47  ;;  %467 = vst.msk [vmem:[#allocation2 + $0x68] sm:$0xff] %vm457_vm1, %v450_v48  ;;  %v452_v60 = vmax.f32 %v436_v49, %v706_v45  ;;  %v455_v63 = vmax.f32 %v439_v57, %v709_v56 }
  0x1c   : > { %v453_v61 = vmax.f32 %v437_v51, %v707_v50  ;;  %468 = vst.msk [vmem:[#allocation2 + $0x78] sm:$0xff] %vm457_vm1, %v451_v54  ;;  %v454_v62 = vmax.f32 %v438_v55, %v708_v53  ;;  %v456_v0 = vmax.f32 %v440_v59, %v710_v58 }
  0x1d   : > { %469 = vst.msk [vmem:[#allocation2 + $0x80] sm:$0xff] %vm457_vm1, %v452_v60  ;;  %v483_v1 = vld [vmem:[#allocation2] ss:$2 sm:$0xff]  ;;  %v499_v2 = vld [vmem:[#allocation2 + $0x1] ss:$2 sm:$0xff]  ;;  %472 = vst.msk [vmem:[#allocation2 + $0xa8] sm:$0xff] %vm457_vm1, %v455_v63 }
  0x1e   : > { %470 = vst.msk [vmem:[#allocation2 + $0x90] sm:$0xff] %vm457_vm1, %v453_v61  ;;  %471 = vst.msk [vmem:[#allocation2 + $0x98] sm:$0xff] %vm457_vm1, %v454_v62  ;;  %v514_v3 = vmax.f32 %v483_v1, %v499_v2  ;;  %v485_v4 = vld [vmem:[#allocation2 + $0x18] ss:$2 sm:$0xff]  ;;  %v501_v5 = vld [vmem:[#allocation2 + $0x19] ss:$2 sm:$0xff] }
  0x1f   : > { %473 = vst.msk [vmem:[#allocation2 + $0xb0] sm:$0xff] %vm457_vm1, %v456_v0  ;;  %v523_v6 = vld [vmem:[#allocation2 + $0x2] ss:$2 sm:$0xff]  ;;  %v515_v7 = vmax.f32 %v485_v4, %v501_v5 }
  0x20   : > { %v538_v8 = vmax.f32 %v514_v3, %v523_v6  ;;  %v525_v9 = vld [vmem:[#allocation2 + $0x1a] ss:$2 sm:$0xff]  ;;  %v503_v11 = vld [vmem:[#allocation2 + $0x31] ss:$2 sm:$0xff] }
  0x21   : > { %v487_v10 = vld [vmem:[#allocation2 + $0x30] ss:$2 sm:$0xff]  ;;  %v539_v12 = vmax.f32 %v515_v7, %v525_v9  ;;  %v505_v15 = vld [vmem:[#allocation2 + $0x49] ss:$2 sm:$0xff] }
  0x22   : > { %v516_v13 = vmax.f32 %v487_v10, %v503_v11  ;;  %v489_v14 = vld [vmem:[#allocation2 + $0x48] ss:$2 sm:$0xff]  ;;  %546 = vst.msk [vmem:[%s860_s19] sm:$0xff] %vm457_vm1, %v538_v8  ;;  %v507_v19 = vld [vmem:[#allocation2 + $0x61] ss:$2 sm:$0xff] }
  0x23   : > { %v527_v16 = vld [vmem:[#allocation2 + $0x32] ss:$2 sm:$0xff]  ;;  %v517_v17 = vmax.f32 %v489_v14, %v505_v15  ;;  %547 = vst.msk [vmem:[%s860_s19 + $0x8] sm:$0xff] %vm457_vm1, %v539_v12  ;;  %v531_v24 = vld [vmem:[#allocation2 + $0x62] ss:$2 sm:$0xff] }
  0x24   : > { %v491_v18 = vld [vmem:[#allocation2 + $0x60] ss:$2 sm:$0xff]  ;;  %v540_v20 = vmax.f32 %v516_v13, %v527_v16  ;;  %v509_v26 = vld [vmem:[#allocation2 + $0x79] ss:$2 sm:$0xff] }
  0x25   : > { %v529_v21 = vld [vmem:[#allocation2 + $0x4a] ss:$2 sm:$0xff]  ;;  %v518_v22 = vmax.f32 %v491_v18, %v507_v19  ;;  %v511_v30 = vld [vmem:[#allocation2 + $0x91] ss:$2 sm:$0xff]  ;;  %v533_v31 = vld [vmem:[#allocation2 + $0x7a] ss:$2 sm:$0xff] }
  0x26   : > { %v541_v23 = vmax.f32 %v517_v17, %v529_v21  ;;  %v493_v25 = vld [vmem:[#allocation2 + $0x78] ss:$2 sm:$0xff]  ;;  %548 = vst.msk [vmem:[%s860_s19 + $0x10] sm:$0xff] %vm457_vm1, %v540_v20  ;;  %v497_v33 = vld [vmem:[#allocation2 + $0xa8] ss:$2 sm:$0xff] }
  0x27   : > { %v542_v27 = vmax.f32 %v518_v22, %v531_v24  ;;  %v519_v28 = vmax.f32 %v493_v25, %v509_v26  ;;  %v495_v29 = vld [vmem:[#allocation2 + $0x90] ss:$2 sm:$0xff]  ;;  %v513_v34 = vld [vmem:[#allocation2 + $0xa9] ss:$2 sm:$0xff] }
  0x28   : > { %549 = vst.msk [vmem:[%s860_s19 + $0x18] sm:$0xff] %vm457_vm1, %v541_v23  ;;  %v520_v32 = vmax.f32 %v495_v29, %v511_v30  ;;  %v535_v36 = vld [vmem:[#allocation2 + $0x92] ss:$2 sm:$0xff]  ;;  %v521_v37 = vmax.f32 %v497_v33, %v513_v34 }
  0x29   : > { %550 = vst.msk [vmem:[%s860_s19 + $0x20] sm:$0xff] %vm457_vm1, %v542_v27  ;;  %v543_v35 = vmax.f32 %v519_v28, %v533_v31  ;;  %v537_v39 = vld [vmem:[#allocation2 + $0xaa] ss:$2 sm:$0xff] }
  0x2a   : > { %v544_v38 = vmax.f32 %v520_v32, %v535_v36  ;;  %v545_v40 = vmax.f32 %v521_v37, %v537_v39 }
  0x2b   : > { %551 = vst.msk [vmem:[%s860_s19 + $0x28] sm:$0xff] %vm457_vm1, %v543_v35 }
  0x2c   : > { %552 = vst.msk [vmem:[%s860_s19 + $0x30] sm:$0xff] %vm457_vm1, %v544_v38  ;;  %553 = vst.msk [vmem:[%s860_s19 + $0x38] sm:$0xff] %vm457_vm1, %v545_v40 }
  0x2d PF: > { %s12_s11 = sadd.s32 1, %s764_s11   ;;  %s890_s9 = smov %s760_s10 }
  0x2e   : > { %p9_p5 = scmp.ge.s32.totalorder %s12_s11, 4   ;;  %s891_s10 = smov %s893_s1 }
  0x30   :  { %11 = sbr.rel (!%p9_p5) target bundleno = 2 (0x2), region = 85 }

</bundles_post_ra>
